<compile_context>
chip_gen: v5e
topology: v5e:2x2
jax: 0.10.0
libtpu: 0.0.40
codegen_flags: <defaults>
</compile_context>

<pallas_src>
import functools
import math

import jax
import jax.numpy as jnp
from jax import lax
from jax.experimental import pallas as pl
from jax.experimental.pallas import tpu as pltpu


# GEMM tile targets (rounded to an aligned divisor per shape below).  tm=512
# for weight reuse (each W tile is streamed M/tm times), tn=256 / tk=512.
_TM, _TN, _TK = 512, 256, 512


@functools.lru_cache(maxsize=None)
def _vmem_limit_bytes():
    """Scoped-VMEM request: above the 16/32 MiB defaults, below physical.

    v5e/v6e: 128 MiB physical -> 96 MiB request;  v7x: 64 MiB -> 48 MiB.
    """
    try:
        cap = int(pltpu.get_tpu_info().vmem_capacity_bytes)
    except Exception:  # conservative fallback if the query is unavailable
        cap = 64 * 1024 * 1024
    return int(min(96 * 1024 * 1024, max(32 * 1024 * 1024, cap - 16 * 1024 * 1024)))


def _pick_tile(dim, target, multiple):
    """Largest divisor of `dim` that is <= target and a multiple of `multiple`.

    Falls back to the full dimension only if no aligned divisor exists (a
    full-dim block is always layout-legal).
    """
    if dim <= target:
        return dim
    t = (target // multiple) * multiple
    while t >= multiple:
        if dim % t == 0:
            return t
        t -= multiple
    return dim  # TODO(synk): masked edge tiles (pl.cdiv grid) for pathological dims.


# ---------------------------------------------------------------------------
# Tiled linear: y = x @ W^T + b   (PyTorch nn.Linear convention: W is [Dout, Din])
# ---------------------------------------------------------------------------
def _linear_kernel(x_ref, w_ref, b_ref, o_ref, acc_ref):
    @pl.when(pl.program_id(2) == 0)
    def _init():
        acc_ref[...] = jnp.zeros_like(acc_ref)

    # Contract last dim of x [tm, tk] with last dim of W [tn, tk] -> [tm, tn];
    # the weight transpose is absorbed into the MXU operand feed.  Operands
    # keep the model dtype (bf16 models feed the MXU in bf16), f32 accumulate.
    acc_ref[...] += lax.dot_general(
        x_ref[...], w_ref[...],
        dimension_numbers=(((1,), (1,)), ((), ())),
        preferred_element_type=jnp.float32)

    @pl.when(pl.program_id(2) == pl.num_programs(2) - 1)
    def _finalize():
        o_ref[...] = (acc_ref[...] + b_ref[...].astype(jnp.float32)).astype(o_ref.dtype)


def linear(x, w, b):
    """x: [M, Din], w: [Dout, Din], b: [Dout] -> [M, Dout]."""
    M, Din = x.shape
    Dout = w.shape[0]
    tm = _pick_tile(M, _TM, 8)        # sublane dim
    tn = _pick_tile(Dout, _TN, 128)   # lane dim of the output
    tk = _pick_tile(Din, _TK, 128)    # lane dim of x / W
    grid = (M // tm, Dout // tn, Din // tk)

    itemsize = x.dtype.itemsize
    # Honest byte count: x re-streamed once per output-column tile, W once per
    # output-row tile (advisory only, but helps XLA overlap surrounding ops).
    cost = pl.CostEstimate(
        flops=2 * M * Dout * Din,
        transcendentals=0,
        bytes_accessed=(M * Din * (Dout // tn) + Dout * Din * (M // tm)
                        + M * Dout + Dout) * itemsize)

    return pl.pallas_call(
        _linear_kernel,
        out_shape=jax.ShapeDtypeStruct((M, Dout), x.dtype),
        grid_spec=pltpu.PrefetchScalarGridSpec(
            num_scalar_prefetch=0,
            grid=grid,
            in_specs=[
                pl.BlockSpec((tm, tk), lambda i, j, k: (i, k)),
                pl.BlockSpec((tn, tk), lambda i, j, k: (j, k)),
                pl.BlockSpec((1, tn), lambda i, j, k: (0, j)),
            ],
            out_specs=pl.BlockSpec((tm, tn), lambda i, j, k: (i, j)),
            scratch_shapes=[pltpu.VMEM((tm, tn), jnp.float32)],
        ),
        compiler_params=pltpu.CompilerParams(
            dimension_semantics=("parallel", "parallel", "arbitrary"),
            vmem_limit_bytes=_vmem_limit_bytes()),
        cost_estimate=cost,
    )(x, w, b.reshape(1, Dout))


# ---------------------------------------------------------------------------
# Grouped-query attention.
#
# Inputs stay in the projection layout (no wrapper transposes):
#   q2d : [B*T, H*dk]   (head h -> contiguous columns h*dk:(h+1)*dk)
#   k2d : [B*T, G*dk]   (group g -> contiguous columns g*dk:(g+1)*dk)
#   v2d : [B*T, G*dk]
# Each grid step processes ALL heads of `gb` KV groups (gb chosen so block
# lane widths are 128-multiples or the full array width), so K/V are fetched
# once per group and stores are lane-dense.
# ---------------------------------------------------------------------------
def _pick_groups_per_block(G, gs, dk):
    H = G * gs
    for gb in range(1, G + 1):
        if G % gb:
            continue
        qw, kw = gb * gs * dk, gb * dk
        if (qw % 128 == 0 or qw == H * dk) and (kw % 128 == 0 or kw == G * dk):
            return gb
    return G


def _exact_reciprocal(l):
    # EUP approximate reciprocal + one Newton step: ~exact softmax semantics
    # at negligible VALU cost on a [tq, 1] vector.
    inv = pl.reciprocal(l, approx=True)
    return inv * (2.0 - l * inv)


def _make_attn_full_kernel(gs, dk, nh_blk):
    """Full-row softmax; also emits the [tq, T] probabilities (torch contract)."""
    scale = 1.0 / math.sqrt(dk)

    def kernel(q_ref, k_ref, v_ref, o_ref, attn_ref):
        q = q_ref[...]        # [tq, nh_blk*dk]
        k = k_ref[...]        # [T,  gb*dk]
        v = v_ref[...]        # [T,  gb*dk]
        outs = []
        for hh in range(nh_blk):          # static unroll over heads of the block
            gg = hh // gs
            qh = q[:, hh * dk:(hh + 1) * dk] * scale     # scale BEFORE the matmul
            kg = k[:, gg * dk:(gg + 1) * dk]
            vg = v[:, gg * dk:(gg + 1) * dk]
            s = lax.dot_general(qh, kg, dimension_numbers=(((1,), (1,)), ((), ())),
                                preferred_element_type=jnp.float32)     # [tq, T]
            m = jnp.max(s, axis=-1, keepdims=True)
            p = jnp.exp(s - m)
            l = jnp.sum(p, axis=-1, keepdims=True)
            inv = _exact_reciprocal(l)
            o = jnp.dot(p.astype(vg.dtype), vg, preferred_element_type=jnp.float32)
            outs.append((o * inv).astype(o_ref.dtype))   # normalize the [tq,dk] output
            attn_ref[0, hh] = (p * inv).astype(attn_ref.dtype)
        o_ref[...] = jnp.concatenate(outs, axis=-1)      # lane-dense [tq, nh_blk*dk] store
        # TODO(synk): attention-dropout inside ScaleDotProductAttention is identity (eval mode).
    return kernel


def _make_attn_flash_kernel(gs, dk, nh_blk):
    """Flash / online-softmax: K/V tiled along T (grid axis 3, 'arbitrary')."""
    scale = 1.0 / math.sqrt(dk)

    def kernel(q_ref, k_ref, v_ref, o_ref, m_sc, l_sc, acc_sc):
        jk = pl.program_id(3)

        @pl.when(jk == 0)
        def _init():
            m_sc[...] = jnp.full_like(m_sc, -jnp.inf)
            l_sc[...] = jnp.zeros_like(l_sc)
            acc_sc[...] = jnp.zeros_like(acc_sc)

        q = q_ref[...]        # [tq,  nh_blk*dk]
        k = k_ref[...]        # [tkv, gb*dk]
        v = v_ref[...]        # [tkv, gb*dk]
        for hh in range(nh_blk):          # static unroll over heads of the block
            gg = hh // gs
            qh = q[:, hh * dk:(hh + 1) * dk] * scale
            kg = k[:, gg * dk:(gg + 1) * dk]
            vg = v[:, gg * dk:(gg + 1) * dk]
            s = lax.dot_general(qh, kg, dimension_numbers=(((1,), (1,)), ((), ())),
                                preferred_element_type=jnp.float32)     # [tq, tkv]
            m_prev = m_sc[hh]                                           # [tq, 1]
            m_new = jnp.maximum(m_prev, jnp.max(s, axis=-1, keepdims=True))
            alpha = jnp.exp(m_prev - m_new)
            p = jnp.exp(s - m_new)
            l_sc[hh] = alpha * l_sc[hh] + jnp.sum(p, axis=-1, keepdims=True)
            acc_sc[hh] = alpha * acc_sc[hh] + jnp.dot(
                p.astype(vg.dtype), vg, preferred_element_type=jnp.float32)
            m_sc[hh] = m_new

        @pl.when(jk == pl.num_programs(3) - 1)
        def _finalize():
            outs = []
            for hh in range(nh_blk):
                inv = _exact_reciprocal(l_sc[hh])
                outs.append((acc_sc[hh] * inv).astype(o_ref.dtype))
            o_ref[...] = jnp.concatenate(outs, axis=-1)
    return kernel


def gqa_attention(q2d, k2d, v2d, B, T, H, G, dk, *, return_attn,
                  tq_target_full=128, tq_target_flash=256, tkv_target=512):
    """q2d: [B*T, H*dk], k2d/v2d: [B*T, G*dk] -> (out2d [B*T, H*dk], attn or None)."""
    gs = H // G
    gb = _pick_groups_per_block(G, gs, dk)
    nh_blk = gb * gs                  # query heads per block (lane width nh_blk*dk)
    ng = G // gb
    dtype = q2d.dtype
    itemsize = dtype.itemsize
    vmem_limit = _vmem_limit_bytes()

    if return_attn:
        # Exact-probability path (torch (out, attn_score) contract).  The T^2
        # HBM write dominates bytes; tq is kept small so the [tq, T] scores and
        # full-T K/V fit VMEM on v7x.  Prefer return_attn=False in production.
        tq = _pick_tile(T, tq_target_full, 8)
        nq = T // tq
        grid = (B, ng, nq)
        in_specs = [
            pl.BlockSpec((tq, nh_blk * dk), lambda b, g, iq: (b * nq + iq, g)),
            pl.BlockSpec((T, gb * dk), lambda b, g, iq: (b, g)),
            pl.BlockSpec((T, gb * dk), lambda b, g, iq: (b, g)),
        ]
        out_shapes = (jax.ShapeDtypeStruct((B * T, H * dk), dtype),
                      jax.ShapeDtypeStruct((B, H, T, T), dtype))
        out_specs = (
            pl.BlockSpec((tq, nh_blk * dk), lambda b, g, iq: (b * nq + iq, g)),
            pl.BlockSpec((1, nh_blk, tq, T), lambda b, g, iq: (b, g, iq, 0)),
        )
        scratch = []
        dims = ("parallel", "parallel", "parallel")
        kernel = _make_attn_full_kernel(gs, dk, nh_blk)
        bytes_accessed = (2 * B * T * H * dk + 2 * B * G * T * dk * nq
                          + B * H * T * T) * itemsize
    else:
        # Flash path: online softmax over KV tiles; VMEM is O(tq*tkv + tq*dk).
        tq = _pick_tile(T, tq_target_flash, 8)
        nq = T // tq
        tkv = _pick_tile(T, tkv_target, 8)
        nkv = T // tkv
        grid = (B, ng, nq, nkv)
        in_specs = [
            pl.BlockSpec((tq, nh_blk * dk), lambda b, g, iq, jk: (b * nq + iq, g)),
            pl.BlockSpec((tkv, gb * dk), lambda b, g, iq, jk: (b * nkv + jk, g)),
            pl.BlockSpec((tkv, gb * dk), lambda b, g, iq, jk: (b * nkv + jk, g)),
        ]
        out_shapes = (jax.ShapeDtypeStruct((B * T, H * dk), dtype),)
        out_specs = (
            pl.BlockSpec((tq, nh_blk * dk), lambda b, g, iq, jk: (b * nq + iq, g)),
        )
        scratch = [pltpu.VMEM((nh_blk, tq, 1), jnp.float32),     # running max
                   pltpu.VMEM((nh_blk, tq, 1), jnp.float32),     # running sum
                   pltpu.VMEM((nh_blk, tq, dk), jnp.float32)]    # output accumulator
        dims = ("parallel", "parallel", "parallel", "arbitrary")
        kernel = _make_attn_flash_kernel(gs, dk, nh_blk)
        bytes_accessed = (2 * B * T * H * dk + 2 * B * G * T * dk * nq) * itemsize

    cost = pl.CostEstimate(flops=4 * B * H * T * T * dk,
                           transcendentals=B * H * T * T,
                           bytes_accessed=bytes_accessed)

    results = pl.pallas_call(
        kernel,
        out_shape=out_shapes,
        grid_spec=pltpu.PrefetchScalarGridSpec(
            num_scalar_prefetch=0,
            grid=grid,
            in_specs=in_specs,
            out_specs=out_specs,
            scratch_shapes=scratch,
        ),
        compiler_params=pltpu.CompilerParams(
            dimension_semantics=dims,
            vmem_limit_bytes=vmem_limit),
        cost_estimate=cost,
    )(q2d, k2d, v2d)

    if return_attn:
        out2d, attn = results
        return out2d, attn
    (out2d,) = results
    return out2d, None


# ---------------------------------------------------------------------------
# Full GroupQueryAttention forward (eval mode).
# ---------------------------------------------------------------------------
def init_params(key, d_model, num_heads, num_groups, dtype=jnp.float32):
    d_k = d_model // num_heads
    kv_dim = num_groups * d_k
    ks = jax.random.split(key, 8)

    def lin(kw, kb, dout, din):
        bound = 1.0 / math.sqrt(din)
        w = jax.random.uniform(kw, (dout, din), dtype, -bound, bound)
        b = jax.random.uniform(kb, (dout,), dtype, -bound, bound)
        return w, b

    w_q, b_q = lin(ks[0], ks[1], d_model, d_model)
    w_k, b_k = lin(ks[2], ks[3], kv_dim, d_model)
    w_v, b_v = lin(ks[4], ks[5], kv_dim, d_model)
    w_o, b_o = lin(ks[6], ks[7], d_model, d_model)
    return dict(w_q=w_q, b_q=b_q, w_k=w_k, b_k=b_k,
                w_v=w_v, b_v=b_v, w_o=w_o, b_o=b_o)


def group_query_attention(params, q_in, k_in, v_in,
                          num_heads, num_groups, mask=None, return_attn=True):
    if mask is not None:
        # TODO(synk): additive/boolean mask support inside the attention kernels.
        raise NotImplementedError("mask is not supported; reference default is mask=None")

    B, T, D = q_in.shape
    d_k = D // num_heads

    # Note: the reference projects BOTH q and k from the `k` input.
    x_k = k_in.reshape(B * T, D)
    q2d = linear(x_k, params["w_q"], params["b_q"])                        # [B*T, H*dk]
    k2d = linear(x_k, params["w_k"], params["b_k"])                        # [B*T, G*dk]
    v2d = linear(v_in.reshape(B * T, D), params["w_v"], params["b_v"])     # [B*T, G*dk]

    # No transposes: the attention kernel indexes heads/groups as contiguous
    # lane blocks and writes its output back in [B*T, H*dk] layout.
    out2d, attn = gqa_attention(q2d, k2d, v2d, B, T, num_heads, num_groups, d_k,
                                return_attn=return_attn)

    out = linear(out2d, params["w_o"], params["b_o"]).reshape(B, T, D)
    # output dropout: identity in eval mode.
    return out, attn


# ---------------------------------------------------------------------------
# Pure-JAX reference (mirrors the PyTorch module) for correctness checking.
# ---------------------------------------------------------------------------
def _reference(params, q_in, k_in, v_in, H, G):
    B, T, D = q_in.shape
    dk = D // H
    gs = H // G
    hp = lax.Precision.HIGHEST

    def lin(x, w, b):
        return jnp.matmul(x, w.T, precision=hp) + b

    q = lin(k_in, params["w_q"], params["b_q"]).reshape(B, T, H, dk).transpose(0, 2, 1, 3)
    k = lin(k_in, params["w_k"], params["b_k"]).reshape(B, T, G, dk).transpose(0, 2, 1, 3)
    v = lin(v_in, params["w_v"], params["b_v"]).reshape(B, T, G, dk).transpose(0, 2, 1, 3)
    k = jnp.repeat(k, gs, axis=1)
    v = jnp.repeat(v, gs, axis=1)
    s = jnp.einsum("bhqd,bhkd->bhqk", q, k, precision=hp) / math.sqrt(dk)
    p = jax.nn.softmax(s, axis=-1)
    o = jnp.einsum("bhqk,bhkd->bhqd", p, v, precision=hp)
    o = o.transpose(0, 2, 1, 3).reshape(B, T, H * dk)
    return lin(o, params["w_o"], params["b_o"]), p


if __name__ == "__main__":
    B, T, D = 2, 8, 32
    num_heads, num_groups = 4, 2

    key = jax.random.PRNGKey(0)
    kp, kq, kk, kv = jax.random.split(key, 4)
    params = init_params(kp, D, num_heads, num_groups)

    q_in = jax.random.normal(kq, (B, T, D), jnp.float32)
    k_in = jax.random.normal(kk, (B, T, D), jnp.float32)
    v_in = jax.random.normal(kv, (B, T, D), jnp.float32)

    # Torch-contract path: returns (out, attn_score).
    out, attn = group_query_attention(params, q_in, k_in, v_in,
                                      num_heads, num_groups, return_attn=True)
    jax.block_until_ready((out, attn))
    assert out.shape == (B, T, D)
    assert attn.shape == (B, num_heads, T, T)
    assert attn.dtype == q_in.dtype

    # Production (flash) path: same output, no T^2 probability write.
    out_flash, attn_none = group_query_attention(params, q_in, k_in, v_in,
                                                 num_heads, num_groups, return_attn=False)
    jax.block_until_ready(out_flash)
    assert attn_none is None
    assert jnp.allclose(out, out_flash, atol=1e-4, rtol=1e-4)

    # Pure-JAX reference (loose tolerance: TPU matmul precision + approx recip).
    out_ref, attn_ref = _reference(params, q_in, k_in, v_in, num_heads, num_groups)
    assert jnp.allclose(out, out_ref, atol=2e-2, rtol=2e-2)
    assert jnp.allclose(attn, attn_ref, atol=2e-2, rtol=2e-2)

    print("KERNEL_OK")
</pallas_src>

<mosaic_0001>
module attributes {stable_mosaic.version = 11 : i64} {
  func.func @_linear_kernel(%arg0: i32, %arg1: i32, %arg2: i32, %arg3: memref<16x32xf32, #tpu.memory_space<vmem>>, %arg4: memref<32x32xf32, #tpu.memory_space<vmem>>, %arg5: memref<1x32xf32, #tpu.memory_space<vmem>>, %arg6: memref<16x32xf32, #tpu.memory_space<vmem>>, %arg7: memref<16x32xf32, #tpu.memory_space<vmem>>) attributes {dimension_semantics = [#tpu.dimension_semantics<parallel>, #tpu.dimension_semantics<parallel>, #tpu.dimension_semantics<arbitrary>], iteration_bounds = array<i64: 1, 1, 1>, scalar_prefetch = 0 : i64, scratch_operands = 1 : i64, tpu.core_type = #tpu.core_type<tc>, window_params = [{transform_indices = @transform_0, window_bounds = array<i64: 16, 32>}, {transform_indices = @transform_1, window_bounds = array<i64: 32, 32>}, {transform_indices = @transform_2, window_bounds = array<i64: 1, 32>}, {transform_indices = @transform_3, window_bounds = array<i64: 16, 32>}]} {
    %c0_i32 = arith.constant 0 : i32
    %0 = arith.cmpi eq, %arg2, %c0_i32 : i32
    %1 = arith.extui %0 : i1 to i32
    %c0_i32_0 = arith.constant 0 : i32
    %2 = arith.cmpi ne, %1, %c0_i32_0 : i32
    scf.if %2 {
      %cst_10 = arith.constant 0.000000e+00 : f32
      %12 = vector.broadcast %cst_10 : f32 to vector<16x32xf32>
      %c0_11 = arith.constant 0 : index
      %c0_12 = arith.constant 0 : index
      %13 = vector.load %arg7[%c0_11, %c0_12] : memref<16x32xf32, #tpu.memory_space<vmem>>, vector<16x32xf32>
      tpu.vector_store %arg7[%c0_11, %c0_12], %12 {strides = array<i32>} : memref<16x32xf32, #tpu.memory_space<vmem>>, vector<16x32xf32>,
    } else {
    }
    %c0 = arith.constant 0 : index
    %c0_1 = arith.constant 0 : index
    %3 = vector.load %arg7[%c0, %c0_1] : memref<16x32xf32, #tpu.memory_space<vmem>>, vector<16x32xf32>
    %c0_2 = arith.constant 0 : index
    %c0_3 = arith.constant 0 : index
    %4 = vector.load %arg3[%c0_2, %c0_3] : memref<16x32xf32, #tpu.memory_space<vmem>>, vector<16x32xf32>
    %c0_4 = arith.constant 0 : index
    %c0_5 = arith.constant 0 : index
    %5 = vector.load %arg4[%c0_4, %c0_5] : memref<32x32xf32, #tpu.memory_space<vmem>>, vector<32x32xf32>
    %cst = arith.constant dense<0.000000e+00> : vector<16x32xf32>
    %6 = tpu.matmul %4, %5, %cst {dimension_numbers = #tpu.dot_dimension_numbers<[1], [1], [0], [0], [0, 0, 1, 0], [], []>} : vector<16x32xf32>, vector<32x32xf32>, vector<16x32xf32> -> vector<16x32xf32>
    %7 = arith.addf %3, %6 : vector<16x32xf32>
    %c0_6 = arith.constant 0 : index
    %c0_7 = arith.constant 0 : index
    %8 = vector.load %arg7[%c0_6, %c0_7] : memref<16x32xf32, #tpu.memory_space<vmem>>, vector<16x32xf32>
    tpu.vector_store %arg7[%c0_6, %c0_7], %7 {strides = array<i32>} : memref<16x32xf32, #tpu.memory_space<vmem>>, vector<16x32xf32>,
    %c0_i32_8 = arith.constant 0 : i32
    %9 = arith.cmpi eq, %arg2, %c0_i32_8 : i32
    %10 = arith.extui %9 : i1 to i32
    %c0_i32_9 = arith.constant 0 : i32
    %11 = arith.cmpi ne, %10, %c0_i32_9 : i32
    scf.if %11 {
      %c0_10 = arith.constant 0 : index
      %c0_11 = arith.constant 0 : index
      %12 = vector.load %arg7[%c0_10, %c0_11] : memref<16x32xf32, #tpu.memory_space<vmem>>, vector<16x32xf32>
      %c0_12 = arith.constant 0 : index
      %c0_13 = arith.constant 0 : index
      %13 = vector.load %arg5[%c0_12, %c0_13] : memref<1x32xf32, #tpu.memory_space<vmem>>, vector<1x32xf32>
      %14 = vector.broadcast %13 : vector<1x32xf32> to vector<16x32xf32>
      %15 = arith.addf %12, %14 : vector<16x32xf32>
      %c0_14 = arith.constant 0 : index
      %c0_15 = arith.constant 0 : index
      %16 = vector.load %arg6[%c0_14, %c0_15] : memref<16x32xf32, #tpu.memory_space<vmem>>, vector<16x32xf32>
      tpu.vector_store %arg6[%c0_14, %c0_15], %15 {strides = array<i32>} : memref<16x32xf32, #tpu.memory_space<vmem>>, vector<16x32xf32>,
    } else {
    }
    return
  }
  func.func @transform_0(%arg0: i32, %arg1: i32, %arg2: i32) -> (i32, i32) {
    %c0_i32 = arith.constant 0 : i32
    return %arg0, %arg2 : i32, i32
  }
  func.func @transform_1(%arg0: i32, %arg1: i32, %arg2: i32) -> (i32, i32) {
    %c0_i32 = arith.constant 0 : i32
    return %arg1, %arg2 : i32, i32
  }
  func.func @transform_2(%arg0: i32, %arg1: i32, %arg2: i32) -> (i32, i32) {
    %c0_i32 = arith.constant 0 : i32
    %c0_i32_0 = arith.constant 0 : i32
    return %c0_i32, %arg1 : i32, i32
  }
  func.func @transform_3(%arg0: i32, %arg1: i32, %arg2: i32) -> (i32, i32) {
    %c0_i32 = arith.constant 0 : i32
    return %arg0, %arg1 : i32, i32
  }
}

</mosaic_0001>

<bundles_post_ra>
// kernel: tpu_custom_call.1
= control target key start
LH: loop header
LB: loop body
LE: loop exit
PB: predicated region body
PF: predicated region fallthrough
CT: control target
= control target key end

     0   :  { %8 = vsyncpa [#allocation4], 0  ;;  %s299_s0 = inlined_call_operand.hbm [shape: f32[16,32], index: 0, kind: input, shape index: {}]   ;;  %s300_s1 = inlined_call_operand.hbm [shape: f32[32,32], index: 1, kind: input, shape index: {}]   ;;  %s301_s2 = inlined_call_operand.vmem [shape: f32[1,32], index: 2, kind: input, shape index: {}]   ;;  %s302_s3 = inlined_call_operand.hbm [shape: f32[16,32], index: 3, kind: output, shape index: {}]  }
   0x1   :  { %9 = vsyncpa [#allocation7], 0 }
   0x2   :  { %10 = vsyncpa [#allocation5], 0  ;;  %s15_s14 = sshll.u32 %s299_s0, 4  ;;  %s236_s15 = smov [#allocation3]   ;;  %s16_s14 = int_to_ptr.hbm [resolvable:$true] %s15_s14 }
   0x3   :  { %s17_s16 = sshll.u32 %s236_s15, 4  ;;  %s28_s19 = sshll.u32 %s300_s1, 4  ;;  %s18_s16 = int_to_ptr.vmem [resolvable:$true] %s17_s16  ;;  %s29_s19 = int_to_ptr.hbm [resolvable:$true] %s28_s19 }
   0x4   :  { %s237_s20 = smov 128   ;;  %s238_s21 = smov 8  }
   0x5   :  { %23 = dma.hbm_to_vmem [thread:$0]  %s16_s14, 256, %s18_s16, [#allocation4], %s237_s20, %s237_s20, %s238_s21  }
   0x6   :  { %s239_s22 = smov [#allocation6]  }
   0x7   :  { %s30_s23 = sshll.u32 %s239_s22, 4  ;;  %s31_s23 = int_to_ptr.vmem [resolvable:$true] %s30_s23 }
   0x8   :  { %36 = dma.hbm_to_vmem [thread:$0]  %s29_s19, 512, %s31_s23, [#allocation7], %s237_s20, %s237_s20, %s238_s21  }
   0x9   :  { %230 = dma.done.wait [#allocation4], 256  }
   0xa   :  { %231 = vsyncadd [#allocation4], 4294967040 }
   0xb   :  { %232 = dma.done.wait [#allocation7], 512  }
   0xc   :  { %233 = vsyncadd [#allocation7], 4294966784  ;;  %vm51_vm0 = vcmask 261120   ;;  %v240_v0 = vmov 0.0   ;;  %v61_v1 = vld [vmem:[#allocation6 + $0x18] sm:$0xff]  ;;  %v60_v2 = vld [vmem:[#allocation6 + $0x10] sm:$0xff] }
   0xd   :  { %52 = vst.msk [vmem:[#allocation2] sm:$0xff] %vm51_vm0, %v240_v0  ;;  %141 = vmatpush.xpose.msk.msra.mxu0 %vm51_vm0, %v61_v1  ;;  %147 = vmatpush.xpose.msk.msra.mxu1 %vm51_vm0, %v61_v1  ;;  %v59_v3 = vld [vmem:[#allocation6 + $0x8] sm:$0xff]  ;;  %v58_v4 = vld [vmem:[#allocation6] sm:$0xff]  ;;  %v56_v5 = vld [vmem:[#allocation3] sm:$0xff]  ;;  %s241_s24 = smov [#allocation8]   ;;  %s127_s28 = sshll.u32 %s302_s3, 4  ;;  %s128_s28 = int_to_ptr.hbm [resolvable:$true] %s127_s28 }
   0xe   :  { %53 = vst.msk [vmem:[#allocation2 + $0x8] sm:$0xff] %vm51_vm0, %v240_v0  ;;  %v57_v6 = vld [vmem:[#allocation3 + $0x8] sm:$0xff]  ;;  %v157_v13 = vld [vmem:[%s301_s2] ss:$0 sm:$0xff]  ;;  %s125_s25 = sshll.u32 %s241_s24, 4  ;;  %s126_s25 = int_to_ptr.vmem [resolvable:$true] %s125_s25 }
  0x11   :  { %142 = vmatpush.xpose.msk.msra.mxu0 %vm51_vm0, %v60_v2  ;;  %148 = vmatpush.xpose.msk.msra.mxu1 %vm51_vm0, %v60_v2 }
  0x14   :  { %v54_v7 = vld [vmem:[#allocation2] sm:$0xff] }
  0x15   :  { %143 = vmatpush.xpose.msk.msra.mxu0 %vm51_vm0, %v59_v3  ;;  %149 = vmatpush.xpose.msk.msra.mxu1 %vm51_vm0, %v59_v3  ;;  %v55_v8 = vld [vmem:[#allocation2 + $0x8] sm:$0xff] }
  0x19   :  { %144 = vmatpush.xpose.msk.msra.mxu0 %vm51_vm0, %v58_v4  ;;  %150 = vmatpush.xpose.msk.msra.mxu1 %vm51_vm0, %v58_v4 }
  0x1c   :  { %145 = vmatmul.msk.f32.vlgmr.msra.gmra.mxu0 %vm51_vm0, %v56_v5  ;;  %146 = vmatmul.msk.f32.vlgmr.msra.gmra.mxu1 %vm51_vm0, %v57_v6 }
  0x99   :  { %v98_v9 = vpop.f32.mrf.mxu0  ;;  %v101_v10 = vpop.f32.mrf.mxu1 }
  0x9a   :  { %v104_v11 = vadd.f32 %v98_v9, %v54_v7  ;;  %v105_v12 = vadd.f32 %v101_v10, %v55_v8 }
  0x9c   :  { %106 = vst.msk [vmem:[#allocation2] sm:$0xff] %vm51_vm0, %v104_v11 }
  0x9d   :  { %107 = vst.msk [vmem:[#allocation2 + $0x8] sm:$0xff] %vm51_vm0, %v105_v12 }
  0xa3   :  { %v111_v14 = vld [vmem:[#allocation2] sm:$0xff] }
  0xa4   :  { %v112_v15 = vld [vmem:[#allocation2 + $0x8] sm:$0xff]  ;;  %v117_v16 = vadd.f32 %v157_v13, %v111_v14 }
  0xa5   :  { %v118_v17 = vadd.f32 %v157_v13, %v112_v15 }
  0xa6   :  { %119 = vst.msk [vmem:[#allocation8] sm:$0xff] %vm51_vm0, %v117_v16 }
  0xa7   :  { %120 = vst.msk [vmem:[#allocation8 + $0x8] sm:$0xff] %vm51_vm0, %v118_v17 }
  0xa8   :  { %133 = dma.vmem_to_hbm [thread:$0]  %s126_s25, 256, %s128_s28, [#allocation5], %s237_s20, %s237_s20, %s238_s21  }
  0xa9   :  { %234 = dma.done.wait [#allocation5], 256  }
  0xaa   :  { %235 = vsyncadd [#allocation5], 4294967040 }
  0xab   :  { %138 = vsyncpa [#allocation4], 1 }
  0xac   :  { %139 = vsyncpa [#allocation7], 1 }
  0xad   :  { %140 = vsyncpa [#allocation5], 1 }

</bundles_post_ra>
